<compile_context>
chip_gen: v7x
topology: tpu7x:2x2x1
jax: 0.10.0
libtpu: 0.0.40
codegen_flags: <defaults>
</compile_context>

<pallas_src>
import jax
import jax.numpy as jnp
import numpy as np
from jax.experimental import pallas as pl
from jax.experimental.pallas import tpu as pltpu

_EPS = 1e-5


def fused_residual_block_kernel(x_ref, w1_ref, g1_ref, be1_ref,
                                w2_ref, g2_ref, be2_ref,
                                selr_ref, sele_ref,
                                o_ref, y1p_ref):
    """Shapes (G = rows packed per slab row, Hs = H/G):
       x_ref:   (N, Hs+2, G*W*C)   per-image super-row-padded input slab
       w*_ref:  (3, G*W*C, G*W*C)  banded weights (prev/cur/next super-row taps)
       g*/be*:  (1, C)             BN gamma / beta
       selr:    (G*W*C, C)         per-channel reduction selector
       sele:    (C, G*W*C)         per-channel broadcast selector
       o_ref:   (N*Hs, G*W*C)      output slab (row-major == NHWC flattened)
       y1p_ref: (N, Hs+2, G*W*C)   VMEM scratch: padded intermediate activation
    """
    N, Hs2, GWC = x_ref.shape
    Hs = Hs2 - 2
    M = N * Hs
    C = g1_ref.shape[-1]
    inv_count = 1.0 / float(M * (GWC // C))          # 1 / (N*H*W)

    def conv3x3(a_ref, wb_ref):
        # Three super-row-shifted, lane-dense (M, G*W*C) windows -> 3 MXU matmuls.
        acc = jnp.zeros((M, GWC), jnp.float32)
        for d in range(3):                            # prev / cur / next super-row
            tap = a_ref[:, d:d + Hs, :].reshape(M, GWC)
            acc = acc + jnp.dot(tap, wb_ref[d],
                                preferred_element_type=jnp.float32)
        return acc

    def bn_train(y, g_ref, be_ref):
        # Single pass: sum & sum-of-squares, then one scale+shift FMA.
        col_sum = jnp.sum(y, axis=0, keepdims=True)                 # (1, GWC)
        col_sumsq = jnp.sum(y * y, axis=0, keepdims=True)           # (1, GWC)
        ch_sum = jnp.dot(col_sum, selr_ref[...],
                         preferred_element_type=jnp.float32)        # (1, C)
        ch_sumsq = jnp.dot(col_sumsq, selr_ref[...],
                           preferred_element_type=jnp.float32)      # (1, C)
        mean = ch_sum * inv_count
        var = ch_sumsq * inv_count - mean * mean                    # biased var
        scale_c = g_ref[...] * jax.lax.rsqrt(var + _EPS)            # (1, C)
        shift_c = be_ref[...] - mean * scale_c                      # (1, C)
        scale = jnp.dot(scale_c, sele_ref[...],
                        preferred_element_type=jnp.float32)         # (1, GWC)
        shift = jnp.dot(shift_c, sele_ref[...],
                        preferred_element_type=jnp.float32)         # (1, GWC)
        return y * scale + shift

    # conv1 -> bn1 -> relu  (conv bias cancels exactly under training-mode BN)
    y1 = jnp.maximum(bn_train(conv3x3(x_ref, w1_ref), g1_ref, be1_ref), 0.0)

    # Stage the padded intermediate in VMEM; it never touches HBM.
    y1p_ref[...] = jnp.zeros_like(y1p_ref)
    y1p_ref[:, 1:Hs + 1, :] = y1.reshape(N, Hs, GWC)

    # conv2 -> bn2 -> +residual -> relu  (residual from the resident input)
    y2 = bn_train(conv3x3(y1p_ref, w2_ref), g2_ref, be2_ref)
    residual = x_ref[:, 1:Hs + 1, :].reshape(M, GWC)
    o_ref[...] = jnp.maximum(y2 + residual, 0.0).astype(o_ref.dtype)


def _banded_weight(w_kkio, W, G):
    """(3, 3, Cin, Cout) -> (3, G*W*Cin, G*W*Cout) super-row banded weights.

    Output inner-row j of a super-row reads input inner-row t of super-row tap
    d (0=prev, 1=cur, 2=next) with kernel row kh = G*(d-1) + t - j + 1; output
    column w reads input column wp with kw = wp - w + 1.  Out-of-range kh/kw
    are dropped, baking 'same' padding into the band.
    """
    KH, KW, Cin, Cout = w_kkio.shape
    d_i = np.arange(3)[:, None, None, None]
    t_i = np.arange(G)[None, :, None, None]
    j_i = np.arange(G)[None, None, :, None]
    kh_i = np.arange(KH)[None, None, None, :]
    kh_sel = (kh_i == G * (d_i - 1) + t_i - j_i + 1).astype(np.float32)  # (3,G,G,KH)

    wp_i = np.arange(W)[:, None, None]
    w_i = np.arange(W)[None, :, None]
    kw_i = np.arange(KW)[None, None, :]
    kw_sel = (kw_i == wp_i - w_i + 1).astype(np.float32)                 # (W,W,KW)

    b = jnp.einsum('dtjh,pwk,hkic->dtpijwc',
                   jnp.asarray(kh_sel), jnp.asarray(kw_sel), w_kkio)
    return b.reshape(3, G * W * Cin, G * W * Cout)


def _pick_group(H, W, C):
    """Smallest divisor G of H with G*W*C a multiple of 128 (lane-dense slab)."""
    for g in range(1, H + 1):
        if H % g == 0 and (g * W * C) % 128 == 0:
            return g
    return 1


@jax.jit
def residual_block(x_nchw, params):
    """Forward pass of ResidualBlock. x_nchw: (N, C, H, W) float32."""
    w1, b1, g1, be1, w2, b2, g2, be2 = params
    del b1, b2  # conv bias is a no-op under training-mode BatchNorm (see kernel)
    N, C, H, W = x_nchw.shape
    KH, KW, Cin, Cout = w1.shape
    assert (KH, KW) == (3, 3) and Cin == C and Cout == C, \
        "residual add requires 3x3 'same' convs with out_channels == in_channels"

    G = _pick_group(H, W, C)
    Hs = H // G
    GWC = G * W * C
    M = N * Hs

    # NCHW -> NHWC, pack G rows per slab row, pad one super-row top/bottom.
    x_nhwc = jnp.transpose(x_nchw, (0, 2, 3, 1))
    x_slab = jnp.pad(x_nhwc.reshape(N, Hs, GWC), ((0, 0), (1, 1), (0, 0)))

    w1b = _banded_weight(w1, W, G)
    w2b = _banded_weight(w2, W, G)

    # Per-channel reduce / broadcast selectors for BN stats in (j, w, c) lanes.
    selr = jnp.asarray(np.tile(np.eye(C, dtype=np.float32), (G * W, 1)))  # (GWC, C)
    sele = selr.T                                                         # (C, GWC)

    # Host-side VMEM sanity check (no grid -> whole problem must be resident).
    vmem_est = 4 * (x_slab.size + w1b.size + w2b.size + selr.size + sele.size
                    + 3 * M * GWC            # accumulators / intermediates
                    + N * (Hs + 2) * GWC     # y1 scratch
                    + M * GWC)               # output
    if vmem_est > 24 * 1024 * 1024:
        # TODO(synk): tile over super-rows with a grid + cross-tile BN sum/sumsq
        # accumulation (training-mode BN needs global statistics).
        raise NotImplementedError("shape too large for the fused single-tile kernel")

    vmem = pl.BlockSpec(memory_space=pltpu.MemorySpace.VMEM)
    out_slab = pl.pallas_call(
        fused_residual_block_kernel,
        out_shape=jax.ShapeDtypeStruct((M, GWC), jnp.float32),
        in_specs=[vmem] * 9,
        out_specs=vmem,
        scratch_shapes=[pltpu.VMEM((N, Hs + 2, GWC), jnp.float32)],
        compiler_params=pltpu.CompilerParams(
            vmem_limit_bytes=32 * 1024 * 1024),
    )(x_slab, w1b, g1, be1, w2b, g2, be2, selr, sele)

    # (N*Hs, G*W*C) row-major == NHWC flattened: free reshape, then back to NCHW.
    return jnp.transpose(out_slab.reshape(N, H, W, C), (0, 3, 1, 2))


# --- pure-JAX reference for verification -----------------------------------
def ref_forward(x, params):
    w1, b1, g1, be1, w2, b2, g2, be2 = params

    def conv(x_nchw, w_kkio, b):
        w_oihw = jnp.transpose(w_kkio, (3, 2, 0, 1))
        y = jax.lax.conv_general_dilated(
            x_nchw, w_oihw, window_strides=(1, 1),
            padding=((1, 1), (1, 1)),
            dimension_numbers=("NCHW", "OIHW", "NCHW"))
        return y + b.reshape(1, -1, 1, 1)

    def bn(y, g, be):
        mean = jnp.mean(y, axis=(0, 2, 3), keepdims=True)
        var = jnp.mean(jnp.square(y - mean), axis=(0, 2, 3), keepdims=True)
        return ((y - mean) * jax.lax.rsqrt(var + _EPS)
                * g.reshape(1, -1, 1, 1) + be.reshape(1, -1, 1, 1))

    out = jax.nn.relu(bn(conv(x, w1, b1), g1, be1))
    out = bn(conv(out, w2, b2), g2, be2)
    return jax.nn.relu(out + x)


if __name__ == "__main__":
    N, C, H, W = 2, 4, 16, 16
    key = jax.random.PRNGKey(0)
    ks = jax.random.split(key, 9)

    x = jax.random.normal(ks[0], (N, C, H, W), jnp.float32)

    # Deterministic parameter init (shapes from nn.Conv2d / nn.BatchNorm2d).
    w1 = 0.1 * jax.random.normal(ks[1], (3, 3, C, C), jnp.float32)   # conv1.weight (HWIO)
    b1 = 0.1 * jax.random.normal(ks[2], (1, C), jnp.float32)         # conv1.bias
    g1 = 1.0 + 0.1 * jax.random.normal(ks[3], (1, C), jnp.float32)   # bn1.weight
    be1 = 0.1 * jax.random.normal(ks[4], (1, C), jnp.float32)        # bn1.bias
    w2 = 0.1 * jax.random.normal(ks[5], (3, 3, C, C), jnp.float32)   # conv2.weight (HWIO)
    b2 = 0.1 * jax.random.normal(ks[6], (1, C), jnp.float32)         # conv2.bias
    g2 = 1.0 + 0.1 * jax.random.normal(ks[7], (1, C), jnp.float32)   # bn2.weight
    be2 = 0.1 * jax.random.normal(ks[8], (1, C), jnp.float32)        # bn2.bias

    params = (w1, b1, g1, be1, w2, b2, g2, be2)

    out = residual_block(x, params)
    out = jax.block_until_ready(out)
    assert out.shape == (N, C, H, W)

    ref = ref_forward(x, params)
    np.testing.assert_allclose(np.asarray(out), np.asarray(ref),
                               rtol=2e-3, atol=2e-3)
    print("KERNEL_OK")
</pallas_src>

<mosaic_0001>
module attributes {stable_mosaic.version = 11 : i64} {
  func.func @fused_residual_block_kernel(%arg0: memref<2x10x128xf32, #tpu.memory_space<vmem>>, %arg1: memref<3x128x128xf32, #tpu.memory_space<vmem>>, %arg2: memref<1x4xf32, #tpu.memory_space<vmem>>, %arg3: memref<1x4xf32, #tpu.memory_space<vmem>>, %arg4: memref<3x128x128xf32, #tpu.memory_space<vmem>>, %arg5: memref<1x4xf32, #tpu.memory_space<vmem>>, %arg6: memref<1x4xf32, #tpu.memory_space<vmem>>, %arg7: memref<128x4xf32, #tpu.memory_space<vmem>>, %arg8: memref<4x128xf32, #tpu.memory_space<vmem>>, %arg9: memref<16x128xf32, #tpu.memory_space<vmem>>, %arg10: memref<2x10x128xf32, #tpu.memory_space<vmem>>) attributes {dimension_semantics = [], scalar_prefetch = 0 : i64, scratch_operands = 1 : i64, tpu.core_type = #tpu.core_type<tc>} {
    %cst = arith.constant 0.000000e+00 : f32
    %0 = vector.broadcast %cst : f32 to vector<16x128xf32>
    %c0 = arith.constant 0 : index
    %c0_0 = arith.constant 0 : index
    %c0_1 = arith.constant 0 : index
    %1 = vector.load %arg0[%c0, %c0_0, %c0_1] : memref<2x10x128xf32, #tpu.memory_space<vmem>>, vector<2x8x128xf32>
    %2 = vector.shape_cast %1 : vector<2x8x128xf32> to vector<16x128xf32>
    %c0_2 = arith.constant 0 : index
    %c0_3 = arith.constant 0 : index
    %c0_4 = arith.constant 0 : index
    %3 = vector.load %arg1[%c0_2, %c0_3, %c0_4] : memref<3x128x128xf32, #tpu.memory_space<vmem>>, vector<1x128x128xf32>
    %4 = vector.shape_cast %3 : vector<1x128x128xf32> to vector<128x128xf32>
    %cst_5 = arith.constant dense<0.000000e+00> : vector<16x128xf32>
    %5 = tpu.matmul %2, %4, %cst_5 {dimension_numbers = #tpu.dot_dimension_numbers<[1], [0], [0], [1], [0, 0, 1, 1], [], []>} : vector<16x128xf32>, vector<128x128xf32>, vector<16x128xf32> -> vector<16x128xf32>
    %6 = arith.addf %0, %5 : vector<16x128xf32>
    %c0_6 = arith.constant 0 : index
    %c1 = arith.constant 1 : index
    %c0_7 = arith.constant 0 : index
    %7 = vector.load %arg0[%c0_6, %c1, %c0_7] : memref<2x10x128xf32, #tpu.memory_space<vmem>>, vector<2x8x128xf32>
    %8 = vector.shape_cast %7 : vector<2x8x128xf32> to vector<16x128xf32>
    %c1_8 = arith.constant 1 : index
    %c0_9 = arith.constant 0 : index
    %c0_10 = arith.constant 0 : index
    %9 = vector.load %arg1[%c1_8, %c0_9, %c0_10] : memref<3x128x128xf32, #tpu.memory_space<vmem>>, vector<1x128x128xf32>
    %10 = vector.shape_cast %9 : vector<1x128x128xf32> to vector<128x128xf32>
    %cst_11 = arith.constant dense<0.000000e+00> : vector<16x128xf32>
    %11 = tpu.matmul %8, %10, %cst_11 {dimension_numbers = #tpu.dot_dimension_numbers<[1], [0], [0], [1], [0, 0, 1, 1], [], []>} : vector<16x128xf32>, vector<128x128xf32>, vector<16x128xf32> -> vector<16x128xf32>
    %12 = arith.addf %6, %11 : vector<16x128xf32>
    %c0_12 = arith.constant 0 : index
    %c2 = arith.constant 2 : index
    %c0_13 = arith.constant 0 : index
    %13 = vector.load %arg0[%c0_12, %c2, %c0_13] : memref<2x10x128xf32, #tpu.memory_space<vmem>>, vector<2x8x128xf32>
    %14 = vector.shape_cast %13 : vector<2x8x128xf32> to vector<16x128xf32>
    %c2_14 = arith.constant 2 : index
    %c0_15 = arith.constant 0 : index
    %c0_16 = arith.constant 0 : index
    %15 = vector.load %arg1[%c2_14, %c0_15, %c0_16] : memref<3x128x128xf32, #tpu.memory_space<vmem>>, vector<1x128x128xf32>
    %16 = vector.shape_cast %15 : vector<1x128x128xf32> to vector<128x128xf32>
    %cst_17 = arith.constant dense<0.000000e+00> : vector<16x128xf32>
    %17 = tpu.matmul %14, %16, %cst_17 {dimension_numbers = #tpu.dot_dimension_numbers<[1], [0], [0], [1], [0, 0, 1, 1], [], []>} : vector<16x128xf32>, vector<128x128xf32>, vector<16x128xf32> -> vector<16x128xf32>
    %18 = arith.addf %12, %17 : vector<16x128xf32>
    %cst_18 = arith.constant dense<0.000000e+00> : vector<128xf32>
    %19 = vector.multi_reduction <add>, %18, %cst_18 [0] : vector<16x128xf32> to vector<128xf32>
    %20 = vector.shape_cast %19 : vector<128xf32> to vector<1x128xf32>
    %21 = arith.mulf %18, %18 : vector<16x128xf32>
    %cst_19 = arith.constant dense<0.000000e+00> : vector<128xf32>
    %22 = vector.multi_reduction <add>, %21, %cst_19 [0] : vector<16x128xf32> to vector<128xf32>
    %23 = vector.shape_cast %22 : vector<128xf32> to vector<1x128xf32>
    %c0_20 = arith.constant 0 : index
    %c0_21 = arith.constant 0 : index
    %24 = vector.load %arg7[%c0_20, %c0_21] : memref<128x4xf32, #tpu.memory_space<vmem>>, vector<128x4xf32>
    %cst_22 = arith.constant dense<0.000000e+00> : vector<1x4xf32>
    %25 = tpu.matmul %20, %24, %cst_22 {dimension_numbers = #tpu.dot_dimension_numbers<[1], [0], [0], [1], [0, 0, 1, 1], [], []>} : vector<1x128xf32>, vector<128x4xf32>, vector<1x4xf32> -> vector<1x4xf32>
    %c0_23 = arith.constant 0 : index
    %c0_24 = arith.constant 0 : index
    %26 = vector.load %arg7[%c0_23, %c0_24] : memref<128x4xf32, #tpu.memory_space<vmem>>, vector<128x4xf32>
    %cst_25 = arith.constant dense<0.000000e+00> : vector<1x4xf32>
    %27 = tpu.matmul %23, %26, %cst_25 {dimension_numbers = #tpu.dot_dimension_numbers<[1], [0], [0], [1], [0, 0, 1, 1], [], []>} : vector<1x128xf32>, vector<128x4xf32>, vector<1x4xf32> -> vector<1x4xf32>
    %cst_26 = arith.constant 0.001953125 : f32
    %28 = vector.broadcast %cst_26 : f32 to vector<1x4xf32>
    %29 = arith.mulf %25, %28 : vector<1x4xf32>
    %cst_27 = arith.constant 0.001953125 : f32
    %30 = vector.broadcast %cst_27 : f32 to vector<1x4xf32>
    %31 = arith.mulf %27, %30 : vector<1x4xf32>
    %32 = arith.mulf %29, %29 : vector<1x4xf32>
    %33 = arith.subf %31, %32 : vector<1x4xf32>
    %c0_28 = arith.constant 0 : index
    %c0_29 = arith.constant 0 : index
    %34 = vector.load %arg2[%c0_28, %c0_29] : memref<1x4xf32, #tpu.memory_space<vmem>>, vector<1x4xf32>
    %cst_30 = arith.constant 9.99999974E-6 : f32
    %35 = vector.broadcast %cst_30 : f32 to vector<1x4xf32>
    %36 = arith.addf %33, %35 : vector<1x4xf32>
    %37 = math.rsqrt %36 : vector<1x4xf32>
    %38 = arith.mulf %34, %37 : vector<1x4xf32>
    %c0_31 = arith.constant 0 : index
    %c0_32 = arith.constant 0 : index
    %39 = vector.load %arg3[%c0_31, %c0_32] : memref<1x4xf32, #tpu.memory_space<vmem>>, vector<1x4xf32>
    %40 = arith.mulf %29, %38 : vector<1x4xf32>
    %41 = arith.subf %39, %40 : vector<1x4xf32>
    %c0_33 = arith.constant 0 : index
    %c0_34 = arith.constant 0 : index
    %42 = vector.load %arg8[%c0_33, %c0_34] : memref<4x128xf32, #tpu.memory_space<vmem>>, vector<4x128xf32>
    %cst_35 = arith.constant dense<0.000000e+00> : vector<1x128xf32>
    %43 = tpu.matmul %38, %42, %cst_35 {dimension_numbers = #tpu.dot_dimension_numbers<[1], [0], [0], [1], [0, 0, 1, 1], [], []>} : vector<1x4xf32>, vector<4x128xf32>, vector<1x128xf32> -> vector<1x128xf32>
    %c0_36 = arith.constant 0 : index
    %c0_37 = arith.constant 0 : index
    %44 = vector.load %arg8[%c0_36, %c0_37] : memref<4x128xf32, #tpu.memory_space<vmem>>, vector<4x128xf32>
    %cst_38 = arith.constant dense<0.000000e+00> : vector<1x128xf32>
    %45 = tpu.matmul %41, %44, %cst_38 {dimension_numbers = #tpu.dot_dimension_numbers<[1], [0], [0], [1], [0, 0, 1, 1], [], []>} : vector<1x4xf32>, vector<4x128xf32>, vector<1x128xf32> -> vector<1x128xf32>
    %46 = vector.broadcast %43 : vector<1x128xf32> to vector<16x128xf32>
    %47 = arith.mulf %18, %46 : vector<16x128xf32>
    %48 = vector.broadcast %45 : vector<1x128xf32> to vector<16x128xf32>
    %49 = arith.addf %47, %48 : vector<16x128xf32>
    %cst_39 = arith.constant 0.000000e+00 : f32
    %50 = vector.broadcast %cst_39 : f32 to vector<16x128xf32>
    %51 = arith.maximumf %49, %50 : vector<16x128xf32>
    %cst_40 = arith.constant 0.000000e+00 : f32
    %52 = vector.broadcast %cst_40 : f32 to vector<2x10x128xf32>
    %c0_41 = arith.constant 0 : index
    %c0_42 = arith.constant 0 : index
    %c0_43 = arith.constant 0 : index
    %53 = vector.load %arg10[%c0_41, %c0_42, %c0_43] : memref<2x10x128xf32, #tpu.memory_space<vmem>>, vector<2x10x128xf32>
    tpu.vector_store %arg10[%c0_41, %c0_42, %c0_43], %52 {strides = array<i32>} : memref<2x10x128xf32, #tpu.memory_space<vmem>>, vector<2x10x128xf32>,
    %54 = vector.shape_cast %51 : vector<16x128xf32> to vector<2x8x128xf32>
    %c0_44 = arith.constant 0 : index
    %c1_45 = arith.constant 1 : index
    %c0_46 = arith.constant 0 : index
    %55 = vector.load %arg10[%c0_44, %c1_45, %c0_46] : memref<2x10x128xf32, #tpu.memory_space<vmem>>, vector<2x8x128xf32>
    tpu.vector_store %arg10[%c0_44, %c1_45, %c0_46], %54 {strides = array<i32>} : memref<2x10x128xf32, #tpu.memory_space<vmem>>, vector<2x8x128xf32>,
    %cst_47 = arith.constant 0.000000e+00 : f32
    %56 = vector.broadcast %cst_47 : f32 to vector<16x128xf32>
    %c0_48 = arith.constant 0 : index
    %c0_49 = arith.constant 0 : index
    %c0_50 = arith.constant 0 : index
    %57 = vector.load %arg10[%c0_48, %c0_49, %c0_50] : memref<2x10x128xf32, #tpu.memory_space<vmem>>, vector<2x8x128xf32>
    %58 = vector.shape_cast %57 : vector<2x8x128xf32> to vector<16x128xf32>
    %c0_51 = arith.constant 0 : index
    %c0_52 = arith.constant 0 : index
    %c0_53 = arith.constant 0 : index
    %59 = vector.load %arg4[%c0_51, %c0_52, %c0_53] : memref<3x128x128xf32, #tpu.memory_space<vmem>>, vector<1x128x128xf32>
    %60 = vector.shape_cast %59 : vector<1x128x128xf32> to vector<128x128xf32>
    %cst_54 = arith.constant dense<0.000000e+00> : vector<16x128xf32>
    %61 = tpu.matmul %58, %60, %cst_54 {dimension_numbers = #tpu.dot_dimension_numbers<[1], [0], [0], [1], [0, 0, 1, 1], [], []>} : vector<16x128xf32>, vector<128x128xf32>, vector<16x128xf32> -> vector<16x128xf32>
    %62 = arith.addf %56, %61 : vector<16x128xf32>
    %c0_55 = arith.constant 0 : index
    %c1_56 = arith.constant 1 : index
    %c0_57 = arith.constant 0 : index
    %63 = vector.load %arg10[%c0_55, %c1_56, %c0_57] : memref<2x10x128xf32, #tpu.memory_space<vmem>>, vector<2x8x128xf32>
    %64 = vector.shape_cast %63 : vector<2x8x128xf32> to vector<16x128xf32>
    %c1_58 = arith.constant 1 : index
    %c0_59 = arith.constant 0 : index
    %c0_60 = arith.constant 0 : index
    %65 = vector.load %arg4[%c1_58, %c0_59, %c0_60] : memref<3x128x128xf32, #tpu.memory_space<vmem>>, vector<1x128x128xf32>
    %66 = vector.shape_cast %65 : vector<1x128x128xf32> to vector<128x128xf32>
    %cst_61 = arith.constant dense<0.000000e+00> : vector<16x128xf32>
    %67 = tpu.matmul %64, %66, %cst_61 {dimension_numbers = #tpu.dot_dimension_numbers<[1], [0], [0], [1], [0, 0, 1, 1], [], []>} : vector<16x128xf32>, vector<128x128xf32>, vector<16x128xf32> -> vector<16x128xf32>
    %68 = arith.addf %62, %67 : vector<16x128xf32>
    %c0_62 = arith.constant 0 : index
    %c2_63 = arith.constant 2 : index
    %c0_64 = arith.constant 0 : index
    %69 = vector.load %arg10[%c0_62, %c2_63, %c0_64] : memref<2x10x128xf32, #tpu.memory_space<vmem>>, vector<2x8x128xf32>
    %70 = vector.shape_cast %69 : vector<2x8x128xf32> to vector<16x128xf32>
    %c2_65 = arith.constant 2 : index
    %c0_66 = arith.constant 0 : index
    %c0_67 = arith.constant 0 : index
    %71 = vector.load %arg4[%c2_65, %c0_66, %c0_67] : memref<3x128x128xf32, #tpu.memory_space<vmem>>, vector<1x128x128xf32>
    %72 = vector.shape_cast %71 : vector<1x128x128xf32> to vector<128x128xf32>
    %cst_68 = arith.constant dense<0.000000e+00> : vector<16x128xf32>
    %73 = tpu.matmul %70, %72, %cst_68 {dimension_numbers = #tpu.dot_dimension_numbers<[1], [0], [0], [1], [0, 0, 1, 1], [], []>} : vector<16x128xf32>, vector<128x128xf32>, vector<16x128xf32> -> vector<16x128xf32>
    %74 = arith.addf %68, %73 : vector<16x128xf32>
    %cst_69 = arith.constant dense<0.000000e+00> : vector<128xf32>
    %75 = vector.multi_reduction <add>, %74, %cst_69 [0] : vector<16x128xf32> to vector<128xf32>
    %76 = vector.shape_cast %75 : vector<128xf32> to vector<1x128xf32>
    %77 = arith.mulf %74, %74 : vector<16x128xf32>
    %cst_70 = arith.constant dense<0.000000e+00> : vector<128xf32>
    %78 = vector.multi_reduction <add>, %77, %cst_70 [0] : vector<16x128xf32> to vector<128xf32>
    %79 = vector.shape_cast %78 : vector<128xf32> to vector<1x128xf32>
    %c0_71 = arith.constant 0 : index
    %c0_72 = arith.constant 0 : index
    %80 = vector.load %arg7[%c0_71, %c0_72] : memref<128x4xf32, #tpu.memory_space<vmem>>, vector<128x4xf32>
    %cst_73 = arith.constant dense<0.000000e+00> : vector<1x4xf32>
    %81 = tpu.matmul %76, %80, %cst_73 {dimension_numbers = #tpu.dot_dimension_numbers<[1], [0], [0], [1], [0, 0, 1, 1], [], []>} : vector<1x128xf32>, vector<128x4xf32>, vector<1x4xf32> -> vector<1x4xf32>
    %c0_74 = arith.constant 0 : index
    %c0_75 = arith.constant 0 : index
    %82 = vector.load %arg7[%c0_74, %c0_75] : memref<128x4xf32, #tpu.memory_space<vmem>>, vector<128x4xf32>
    %cst_76 = arith.constant dense<0.000000e+00> : vector<1x4xf32>
    %83 = tpu.matmul %79, %82, %cst_76 {dimension_numbers = #tpu.dot_dimension_numbers<[1], [0], [0], [1], [0, 0, 1, 1], [], []>} : vector<1x128xf32>, vector<128x4xf32>, vector<1x4xf32> -> vector<1x4xf32>
    %cst_77 = arith.constant 0.001953125 : f32
    %84 = vector.broadcast %cst_77 : f32 to vector<1x4xf32>
    %85 = arith.mulf %81, %84 : vector<1x4xf32>
    %cst_78 = arith.constant 0.001953125 : f32
    %86 = vector.broadcast %cst_78 : f32 to vector<1x4xf32>
    %87 = arith.mulf %83, %86 : vector<1x4xf32>
    %88 = arith.mulf %85, %85 : vector<1x4xf32>
    %89 = arith.subf %87, %88 : vector<1x4xf32>
    %c0_79 = arith.constant 0 : index
    %c0_80 = arith.constant 0 : index
    %90 = vector.load %arg5[%c0_79, %c0_80] : memref<1x4xf32, #tpu.memory_space<vmem>>, vector<1x4xf32>
    %cst_81 = arith.constant 9.99999974E-6 : f32
    %91 = vector.broadcast %cst_81 : f32 to vector<1x4xf32>
    %92 = arith.addf %89, %91 : vector<1x4xf32>
    %93 = math.rsqrt %92 : vector<1x4xf32>
    %94 = arith.mulf %90, %93 : vector<1x4xf32>
    %c0_82 = arith.constant 0 : index
    %c0_83 = arith.constant 0 : index
    %95 = vector.load %arg6[%c0_82, %c0_83] : memref<1x4xf32, #tpu.memory_space<vmem>>, vector<1x4xf32>
    %96 = arith.mulf %85, %94 : vector<1x4xf32>
    %97 = arith.subf %95, %96 : vector<1x4xf32>
    %c0_84 = arith.constant 0 : index
    %c0_85 = arith.constant 0 : index
    %98 = vector.load %arg8[%c0_84, %c0_85] : memref<4x128xf32, #tpu.memory_space<vmem>>, vector<4x128xf32>
    %cst_86 = arith.constant dense<0.000000e+00> : vector<1x128xf32>
    %99 = tpu.matmul %94, %98, %cst_86 {dimension_numbers = #tpu.dot_dimension_numbers<[1], [0], [0], [1], [0, 0, 1, 1], [], []>} : vector<1x4xf32>, vector<4x128xf32>, vector<1x128xf32> -> vector<1x128xf32>
    %c0_87 = arith.constant 0 : index
    %c0_88 = arith.constant 0 : index
    %100 = vector.load %arg8[%c0_87, %c0_88] : memref<4x128xf32, #tpu.memory_space<vmem>>, vector<4x128xf32>
    %cst_89 = arith.constant dense<0.000000e+00> : vector<1x128xf32>
    %101 = tpu.matmul %97, %100, %cst_89 {dimension_numbers = #tpu.dot_dimension_numbers<[1], [0], [0], [1], [0, 0, 1, 1], [], []>} : vector<1x4xf32>, vector<4x128xf32>, vector<1x128xf32> -> vector<1x128xf32>
    %102 = vector.broadcast %99 : vector<1x128xf32> to vector<16x128xf32>
    %103 = arith.mulf %74, %102 : vector<16x128xf32>
    %104 = vector.broadcast %101 : vector<1x128xf32> to vector<16x128xf32>
    %105 = arith.addf %103, %104 : vector<16x128xf32>
    %c0_90 = arith.constant 0 : index
    %c1_91 = arith.constant 1 : index
    %c0_92 = arith.constant 0 : index
    %106 = vector.load %arg0[%c0_90, %c1_91, %c0_92] : memref<2x10x128xf32, #tpu.memory_space<vmem>>, vector<2x8x128xf32>
    %107 = vector.shape_cast %106 : vector<2x8x128xf32> to vector<16x128xf32>
    %108 = arith.addf %105, %107 : vector<16x128xf32>
    %cst_93 = arith.constant 0.000000e+00 : f32
    %109 = vector.broadcast %cst_93 : f32 to vector<16x128xf32>
    %110 = arith.maximumf %108, %109 : vector<16x128xf32>
    %c0_94 = arith.constant 0 : index
    %c0_95 = arith.constant 0 : index
    %111 = vector.load %arg9[%c0_94, %c0_95] : memref<16x128xf32, #tpu.memory_space<vmem>>, vector<16x128xf32>
    tpu.vector_store %arg9[%c0_94, %c0_95], %110 {strides = array<i32>} : memref<16x128xf32, #tpu.memory_space<vmem>>, vector<16x128xf32>,
    return
  }
}

</mosaic_0001>

<bundles_post_ra>
// kernel: residual_block.1
= control target key start
LH: loop header
LB: loop body
LE: loop exit
PB: predicated region body
PF: predicated region fallthrough
CT: control target
= control target key end

     0   :  { %v2239_v3 = vmov 0.0|0.0   ;;  %vm2240_vm0 = vmmov 0   ;;  %vm503_vm1 = vcmask 1043456   ;;  %vm499_vm2 = vcmask 31744   ;;  %s2820_s1 = inlined_call_operand.vmem [shape: f32[3,128,128], index: 1, kind: input, shape index: {}]   ;;  %s2821_s0 = inlined_call_operand.vmem [shape: f32[2,10,128], index: 0, kind: input, shape index: {}]   ;;  %s2822_s7 = inlined_call_operand.vmem [shape: f32[128,4], index: 7, kind: input, shape index: {}]   ;;  %s2823_s8 = inlined_call_operand.vmem [shape: f32[4,128], index: 8, kind: input, shape index: {}]   ;;  %s2824_s2 = inlined_call_operand.vmem [shape: f32[1,4], index: 2, kind: input, shape index: {}]   ;;  %s2825_s4 = inlined_call_operand.vmem [shape: f32[3,128,128], index: 4, kind: input, shape index: {}]   ;;  %s2826_s3 = inlined_call_operand.vmem [shape: f32[1,4], index: 3, kind: input, shape index: {}]   ;;  %s2827_s5 = inlined_call_operand.vmem [shape: f32[1,4], index: 5, kind: input, shape index: {}]   ;;  %s2828_s6 = inlined_call_operand.vmem [shape: f32[1,4], index: 6, kind: input, shape index: {}]   ;;  %s2829_s9 = inlined_call_operand.vmem [shape: f32[16,128], index: 9, kind: output, shape index: {}]  }
   0x1   :  { %v1310_v0 = vld [vmem:[%s2820_s1 + $0x80] sm:$0xff]  ;;  %v1311_v1 = vld [vmem:[%s2820_s1 + $0x88] sm:$0xff]  ;;  %v1312_v2 = vld [vmem:[%s2820_s1 + $0x90] sm:$0xff]  ;;  %2032 = vmatprep.subr.bf16.mxu1 %v2239_v3 }
   0x2   :  { %v1936_v4 = vpack.c.bf16 %v1311_v1, %v1310_v0  ;;  %v1313_v5 = vld [vmem:[%s2820_s1 + $0x98] sm:$0xff]  ;;  %v1314_v7 = vld [vmem:[%s2820_s1 + $0xa0] sm:$0xff]  ;;  %v1315_v8 = vld [vmem:[%s2820_s1 + $0xa8] sm:$0xff] }
   0x3   :  { %v1940_v6 = vpack.c.bf16 %v1313_v5, %v1312_v2  ;;  %v1944_v9 = vpack.c.bf16 %v1315_v8, %v1314_v7  ;;  %v2314_v10 = vld [vmem:[%s2821_s0 + $0x1] sm:$0xff]  ;;  %v1316_v11 = vld [vmem:[%s2820_s1 + $0xb0] sm:$0xff]  ;;  %v1317_v12 = vld [vmem:[%s2820_s1 + $0xb8] sm:$0xff] }
   0x4   :  { %1937 = vmatprep.subr.bf16.mxu0 %v1936_v4  ;;  %1598 = vmatprep.mubr.f32.mxu0 %v2314_v10  ;;  %v1948_v13 = vpack.c.bf16 %v1317_v12, %v1316_v11  ;;  %v1318_v14 = vld [vmem:[%s2820_s1 + $0xc0] sm:$0xff]  ;;  %v1319_v15 = vld [vmem:[%s2820_s1 + $0xc8] sm:$0xff]  ;;  %v1320_v17 = vld [vmem:[%s2820_s1 + $0xd0] sm:$0xff] }
   0x5   :  { %1939 = vmatpush3.bf16.msra.mxu0 %v1936_v4  ;;  %v1952_v16 = vpack.c.bf16 %v1319_v15, %v1318_v14  ;;  %v1321_v18 = vld [vmem:[%s2820_s1 + $0xd8] sm:$0xff]  ;;  %v1322_v20 = vld [vmem:[%s2820_s1 + $0xe0] sm:$0xff]  ;;  %v1323_v21 = vld [vmem:[%s2820_s1 + $0xe8] sm:$0xff] }
   0x6   :  { %1941 = vmatprep.subr.bf16.mxu0 %v1940_v6  ;;  %v1956_v19 = vpack.c.bf16 %v1321_v18, %v1320_v17  ;;  %v331_v22 = vld [vmem:[%s2822_s7] sm:$0xff]  ;;  %v332_v23 = vld [vmem:[%s2822_s7 + $0x8] sm:$0xff]  ;;  %v333_v24 = vld [vmem:[%s2822_s7 + $0x10] sm:$0xff]  ;;  %v1960_v27 = vpack.c.bf16 %v1323_v21, %v1322_v20 }
   0x7   :  { %v2350_v25 = vpack.c.bf16 %v332_v23, %v331_v22  ;;  %v334_v26 = vld [vmem:[%s2822_s7 + $0x18] sm:$0xff]  ;;  %v1324_v28 = vld [vmem:[%s2820_s1 + $0xf0] sm:$0xff]  ;;  %v335_v31 = vld [vmem:[%s2822_s7 + $0x20] sm:$0xff] }
   0x8   :  { %v2359_v29 = vpack.c.bf16 %v334_v26, %v333_v24  ;;  %v1325_v30 = vld [vmem:[%s2820_s1 + $0xf8] sm:$0xff]  ;;  %v336_v32 = vld [vmem:[%s2822_s7 + $0x28] sm:$0xff]  ;;  %v34_v34 = vld [vmem:[%s2820_s1] sm:$0xff] }
   0x9   :  { %1943 = vmatpush3.bf16.msra.mxu0 %v1940_v6  ;;  %2034 = vmatpush3.bf16.msra.mxu1 %v2350_v25  ;;  %v1964_v33 = vpack.c.bf16 %v1325_v30, %v1324_v28  ;;  %v2375_v35 = vpack.c.bf16 %v336_v32, %v335_v31  ;;  %v35_v36 = vld [vmem:[%s2820_s1 + $0x8] sm:$0xff]  ;;  %v337_v37 = vld [vmem:[%s2822_s7 + $0x30] sm:$0xff]  ;;  %v338_v38 = vld [vmem:[%s2822_s7 + $0x38] sm:$0xff] }
   0xa   :  { %1945 = vmatprep.subr.bf16.mxu0 %v1944_v9  ;;  %2035 = vmatprep.subr.bf16.mxu1 %v2239_v3  ;;  %v1968_v39 = vpack.c.bf16 %v35_v36, %v34_v34  ;;  %v2388_v40 = vpack.c.bf16 %v338_v38, %v337_v37  ;;  %v36_v41 = vld [vmem:[%s2820_s1 + $0x10] sm:$0xff]  ;;  %v37_v42 = vld [vmem:[%s2820_s1 + $0x18] sm:$0xff]  ;;  %v32_v45 = vld [vmem:[%s2821_s0] sm:$0xff] }
   0xb   :  { %v2400_v43 = vld [vmem:[%s2821_s0 + $0x11] sm:$0xff]  ;;  %v1972_v44 = vpack.c.bf16 %v37_v42, %v36_v41  ;;  %v38_v46 = vld [vmem:[%s2820_s1 + $0x20] sm:$0xff]  ;;  %v39_v47 = vld [vmem:[%s2820_s1 + $0x28] sm:$0xff] }
   0xc   :  { %v1976_v48 = vpack.c.bf16 %v39_v47, %v38_v46  ;;  %v40_v49 = vld [vmem:[%s2820_s1 + $0x30] sm:$0xff]  ;;  %v41_v50 = vld [vmem:[%s2820_s1 + $0x38] sm:$0xff]  ;;  %v42_v52 = vld [vmem:[%s2820_s1 + $0x40] sm:$0xff]  ;;  %v2241_v46 = vmov 0.0  }
   0xd   :  { %1947 = vmatpush3.bf16.msra.mxu0 %v1944_v9  ;;  %2037 = vmatpush3.bf16.msra.mxu1 %v2359_v29  ;;  %v1980_v51 = vpack.c.bf16 %v41_v50, %v40_v49  ;;  %v43_v53 = vld [vmem:[%s2820_s1 + $0x48] sm:$0xff]  ;;  %v44_v55 = vld [vmem:[%s2820_s1 + $0x50] sm:$0xff]  ;;  %v45_v56 = vld [vmem:[%s2820_s1 + $0x58] sm:$0xff]  ;;  %664 = vst [vmem:[#allocation2] sm:$0xff] %v2241_v46 }
   0xe   :  { %1949 = vmatprep.subr.bf16.mxu0 %v1948_v13  ;;  %2038 = vmatprep.subr.bf16.mxu1 %v2239_v3  ;;  %v1984_v54 = vpack.c.bf16 %v43_v53, %v42_v52  ;;  %v1988_v57 = vpack.c.bf16 %v45_v56, %v44_v55  ;;  %v46_v58 = vld [vmem:[%s2820_s1 + $0x60] sm:$0xff]  ;;  %v47_v59 = vld [vmem:[%s2820_s1 + $0x68] sm:$0xff]  ;;  %v48_v61 = vld [vmem:[%s2820_s1 + $0x70] sm:$0xff]  ;;  %665 = vst [vmem:[#allocation2 + $0x8] sm:$0x3] %v2241_v46 }
   0xf   :  { %v1992_v60 = vpack.c.bf16 %v47_v59, %v46_v58  ;;  %v49_v62 = vld [vmem:[%s2820_s1 + $0x78] sm:$0xff]  ;;  %v1326_v0 = vld [vmem:[%s2820_s1 + $0x100] sm:$0xff]  ;;  %v1327_v1 = vld [vmem:[%s2820_s1 + $0x108] sm:$0xff]  ;;  %1703 = vmatprep.mubr.msk.f32.mxu1 %vm2240_vm0, %v2241_v46  ;;  %666 = vst [vmem:[#allocation2 + $0x10] sm:$0xff] %v2241_v46 }
  0x10   :  { %v1996_v63 = vpack.c.bf16 %v49_v62, %v48_v61  ;;  %v2000_v2 = vpack.c.bf16 %v1327_v1, %v1326_v0  ;;  %v1328_v4 = vld [vmem:[%s2820_s1 + $0x110] sm:$0xff]  ;;  %v1329_v5 = vld [vmem:[%s2820_s1 + $0x118] sm:$0xff]  ;;  %v219_v8 = vld [vmem:[%s2821_s0 + $0x2] sm:$0xff]  ;;  %667 = vst [vmem:[#allocation2 + $0x18] sm:$0x3] %v2241_v46 }
  0x11   :  { %1951 = vmatpush3.bf16.msra.mxu0 %v1948_v13  ;;  %2040 = vmatpush3.bf16.msra.mxu1 %v2375_v35  ;;  %v33_v6 = vld [vmem:[%s2821_s0 + $0x10] sm:$0xff]  ;;  %v2004_v7 = vpack.c.bf16 %v1329_v5, %v1328_v4  ;;  %v1330_v9 = vld [vmem:[%s2820_s1 + $0x120] sm:$0xff]  ;;  %v1331_v11 = vld [vmem:[%s2820_s1 + $0x128] sm:$0xff] }
  0x12   :  { %1953 = vmatprep.subr.bf16.mxu0 %v1952_v16  ;;  %2041 = vmatprep.subr.bf16.mxu1 %v2239_v3  ;;  %v2008_v12 = vpack.c.bf16 %v1331_v11, %v1330_v9  ;;  %v1332_v13 = vld [vmem:[%s2820_s1 + $0x130] sm:$0xff]  ;;  %v1333_v14 = vld [vmem:[%s2820_s1 + $0x138] sm:$0xff]  ;;  %v1335_v17 = vld [vmem:[%s2820_s1 + $0x148] sm:$0xff] }
  0x13   :  { %v2012_v15 = vpack.c.bf16 %v1333_v14, %v1332_v13  ;;  %v1337_v20 = vld [vmem:[%s2820_s1 + $0x158] sm:$0xff]  ;;  %v1338_v22 = vld [vmem:[%s2820_s1 + $0x160] sm:$0xff]  ;;  %v1339_v23 = vld [vmem:[%s2820_s1 + $0x168] sm:$0xff] }
  0x14   :  { %v2024_v24 = vpack.c.bf16 %v1339_v23, %v1338_v22  ;;  %v1340_v26 = vld [vmem:[%s2820_s1 + $0x170] sm:$0xff]  ;;  %v339_v31 = vld [vmem:[%s2822_s7 + $0x40] sm:$0xff]  ;;  %v340_v32 = vld [vmem:[%s2822_s7 + $0x48] sm:$0xff] }
  0x15   :  { %1955 = vmatpush3.bf16.msra.mxu0 %v1952_v16  ;;  %2043 = vmatpush3.bf16.msra.mxu1 %v2388_v40  ;;  %v1334_v16 = vld [vmem:[%s2820_s1 + $0x140] sm:$0xff]  ;;  %v220_v30 = vld [vmem:[%s2821_s0 + $0x12] sm:$0xff] }
  0x16   :  { %1957 = vmatprep.subr.bf16.mxu0 %v1956_v19  ;;  %2044 = vmatprep.subr.bf16.mxu1 %v2239_v3  ;;  %v2016_v18 = vpack.c.bf16 %v1335_v17, %v1334_v16  ;;  %v341_v34 = vld [vmem:[%s2822_s7 + $0x50] sm:$0xff]  ;;  %v342_v36 = vld [vmem:[%s2822_s7 + $0x58] sm:$0xff]  ;;  %v343_v38 = vld [vmem:[%s2822_s7 + $0x60] sm:$0xff] }
  0x17   :  { %v2528_v37 = vpack.c.bf16 %v342_v36, %v341_v34  ;;  %v345_v42 = vld [vmem:[%s2822_s7 + $0x70] sm:$0xff]  ;;  %v498_v1 = vld [vmem:[%s2823_s8] sm:$0xf]  ;;  %v1355_v36 = vld [vmem:[%s2825_s4 + $0xc8] sm:$0xff] }
  0x18   :  { %v491_v13 = vld [vmem:[%s2824_s2] sm:$0x1] }
  0x19   :  { %1959 = vmatpush3.bf16.msra.mxu0 %v1956_v19  ;;  %v1336_v19 = vld [vmem:[%s2820_s1 + $0x150] sm:$0xff]  ;;  %v1346_v14 = vld [vmem:[%s2825_s4 + $0x80] sm:$0xff] }
  0x1a   :  { %1961 = vmatprep.subr.bf16.mxu0 %v1960_v27  ;;  %v2020_v21 = vpack.c.bf16 %v1337_v20, %v1336_v19  ;;  %v495_v19 = vld [vmem:[%s2826_s3] sm:$0x1]  ;;  %v1348_v20 = vld [vmem:[%s2825_s4 + $0x90] sm:$0xff] }
  0x1b   :  { %v1354_v34 = vld [vmem:[%s2825_s4 + $0xc0] sm:$0xff] }
  0x1d   :  { %1963 = vmatpush3.bf16.msra.mxu0 %v1960_v27  ;;  %v1341_v27 = vld [vmem:[%s2820_s1 + $0x178] sm:$0xff] }
  0x1e   :  { %1965 = vmatprep.subr.bf16.mxu0 %v1964_v33  ;;  %v2028_v28 = vpack.c.bf16 %v1341_v27, %v1340_v26  ;;  %v1350_v26 = vld [vmem:[%s2825_s4 + $0xa0] sm:$0xff]  ;;  %v1351_v27 = vld [vmem:[%s2825_s4 + $0xa8] sm:$0xff] }
  0x21   :  { %1967 = vmatpush3.bf16.msra.mxu0 %v1964_v33  ;;  %v2516_v33 = vpack.c.bf16 %v340_v32, %v339_v31  ;;  %v1353_v31 = vld [vmem:[%s2825_s4 + $0xb8] sm:$0xff] }
  0x22   :  { %1969 = vmatprep.subr.bf16.mxu0 %v1968_v39 }
  0x23   :  { %2046 = vmatpush3.bf16.msra.mxu1 %v2516_v33 }
  0x24   :  { %1599 = vmatmul.mubr.f32.vlgmr.msra.gmra.mrb[0].mxu0 %v2400_v43  ;;  %2047 = vmatprep.subr.bf16.mxu1 %v2239_v3 }
  0x25   :  { %1971 = vmatpush3.bf16.msra.mxu0 %v1968_v39  ;;  %1633 = vmatprep.mubr.f32.mxu0 %v32_v45  ;;  %v344_v39 = vld [vmem:[%s2822_s7 + $0x68] sm:$0xff] }
  0x26   :  { %1973 = vmatprep.subr.bf16.mxu0 %v1972_v44  ;;  %v2540_v41 = vpack.c.bf16 %v344_v39, %v343_v38  ;;  %v2096_v38 = vpack.c.bf16 %v1355_v36, %v1354_v34  ;;  %v1356_v39 = vld [vmem:[%s2825_s4 + $0xd0] sm:$0xff]  ;;  %v1362_v34 = vld [vmem:[%s2825_s4 + $0x100] sm:$0xff]  ;;  %v1363_v36 = vld [vmem:[%s2825_s4 + $0x108] sm:$0xff] }
  0x27   :  { %2049 = vmatpush3.bf16.msra.mxu1 %v2528_v37 }
  0x28   :  { %2050 = vmatprep.subr.bf16.mxu1 %v2239_v3 }
  0x29   :  { %1975 = vmatpush3.bf16.msra.mxu0 %v1972_v44  ;;  %v346_v44 = vld [vmem:[%s2822_s7 + $0x78] sm:$0xff] }
  0x2a   :  { %1977 = vmatprep.subr.bf16.mxu0 %v1976_v48  ;;  %v2552_v45 = vpack.c.bf16 %v346_v44, %v345_v42  ;;  %v1357_v42 = vld [vmem:[%s2825_s4 + $0xd8] sm:$0xff] }
  0x2b   :  { %2052 = vmatpush3.bf16.msra.mxu1 %v2540_v41  ;;  %v2100_v44 = vpack.c.bf16 %v1357_v42, %v1356_v39  ;;  %v1364_v39 = vld [vmem:[%s2825_s4 + $0x110] sm:$0xff]  ;;  %v1365_v42 = vld [vmem:[%s2825_s4 + $0x118] sm:$0xff] }
  0x2c   :  { %2053 = vmatprep.subr.bf16.mxu1 %v2239_v3 }
  0x2d   :  { %1979 = vmatpush3.bf16.msra.mxu0 %v1976_v48 }
  0x2e   :  { %1981 = vmatprep.subr.bf16.mxu0 %v1980_v51 }
  0x2f   :  { %2055 = vmatpush3.bf16.msra.mxu1 %v2552_v45 }
  0x30   :  { %2056 = vmatprep.subr.bf16.mxu1 %v2239_v3 }
  0x31   :  { %1983 = vmatpush3.bf16.msra.mxu0 %v1980_v51 }
  0x32   :  { %1985 = vmatprep.subr.bf16.mxu0 %v1984_v54 }
  0x35   :  { %1987 = vmatpush3.bf16.msra.mxu0 %v1984_v54 }
  0x36   :  { %1989 = vmatprep.subr.bf16.mxu0 %v1988_v57 }
  0x39   :  { %1991 = vmatpush3.bf16.msra.mxu0 %v1988_v57 }
  0x3a   :  { %1993 = vmatprep.subr.bf16.mxu0 %v1992_v60 }
  0x3d   :  { %1995 = vmatpush3.bf16.msra.mxu0 %v1992_v60 }
  0x3e   :  { %1997 = vmatprep.subr.bf16.mxu0 %v1996_v63 }
  0x41   :  { %1999 = vmatpush3.bf16.msra.mxu0 %v1996_v63 }
  0x42   :  { %2001 = vmatprep.subr.bf16.mxu0 %v2000_v2 }
  0x44   :  { %1634 = vmatmul.mubr.f32.vlgmr.msra.gmra.mrb[0].mxu0 %v33_v6 }
  0x45   :  { %2003 = vmatpush3.bf16.msra.mxu0 %v2000_v2  ;;  %1668 = vmatprep.mubr.f32.mxu0 %v219_v8 }
  0x46   :  { %2005 = vmatprep.subr.bf16.mxu0 %v2004_v7 }
  0x49   :  { %2007 = vmatpush3.bf16.msra.mxu0 %v2004_v7 }
  0x4a   :  { %2009 = vmatprep.subr.bf16.mxu0 %v2008_v12 }
  0x4d   :  { %2011 = vmatpush3.bf16.msra.mxu0 %v2008_v12 }
  0x4e   :  { %2013 = vmatprep.subr.bf16.mxu0 %v2012_v15 }
  0x51   :  { %2015 = vmatpush3.bf16.msra.mxu0 %v2012_v15  ;;  %v1347_v15 = vld [vmem:[%s2825_s4 + $0x88] sm:$0xff] }
  0x52   :  { %2017 = vmatprep.subr.bf16.mxu0 %v2016_v18 }
  0x55   :  { %2019 = vmatpush3.bf16.msra.mxu0 %v2016_v18  ;;  %v2080_v18 = vpack.c.bf16 %v1347_v15, %v1346_v14  ;;  %v678_v15 = vld [vmem:[%s2825_s4 + $0x30] sm:$0xff] }
  0x56   :  { %2021 = vmatprep.subr.bf16.mxu0 %v2020_v21 }
  0x59   :  { %2023 = vmatpush3.bf16.msra.mxu0 %v2020_v21  ;;  %v1349_v21 = vld [vmem:[%s2825_s4 + $0x98] sm:$0xff] }
  0x5a   :  { %2025 = vmatprep.subr.bf16.mxu0 %v2024_v24 }
  0x5d   :  { %2027 = vmatpush3.bf16.msra.mxu0 %v2024_v24  ;;  %v2084_v24 = vpack.c.bf16 %v1349_v21, %v1348_v20  ;;  %v681_v20 = vld [vmem:[%s2825_s4 + $0x48] sm:$0xff] }
  0x5e   :  { %2029 = vmatprep.subr.bf16.mxu0 %v2028_v28 }
  0x61   :  { %2031 = vmatpush3.bf16.msra.mxu0 %v2028_v28  ;;  %v2088_v28 = vpack.c.bf16 %v1351_v27, %v1350_v26  ;;  %v684_v26 = vld [vmem:[%s2825_s4 + $0x60] sm:$0xff]  ;;  %v685_v27 = vld [vmem:[%s2825_s4 + $0x68] sm:$0xff] }
  0x62   :  { %2176 = vmatprep.subr.bf16.mxu0 %v2239_v3 }
  0x64   :  { %1669 = vmatmul.mubr.f32.vlgmr.msra.gmra.mrb[0].mxu0 %v220_v30  ;;  %v1352_v30 = vld [vmem:[%s2825_s4 + $0xb0] sm:$0xff] }
  0x65   :  { %2178 = vmatpush3.bf16.msra.mxu0 %v2350_v25  ;;  %1888 = vmatprep.mubr.msk.f32.mxu0 %vm2240_vm0, %v2241_v46  ;;  %v2092_v32 = vpack.c.bf16 %v1353_v31, %v1352_v30  ;;  %v686_v30 = vld [vmem:[%s2825_s4 + $0x70] sm:$0xff]  ;;  %v687_v31 = vld [vmem:[%s2825_s4 + $0x78] sm:$0xff] }
  0x66   :  { %2179 = vmatprep.subr.bf16.mxu0 %v2239_v3 }
  0x69   :  { %2181 = vmatpush3.bf16.msra.mxu0 %v2359_v29 }
  0x6a   :  { %2182 = vmatprep.subr.bf16.mxu0 %v2239_v3 }
  0x6d   :  { %2184 = vmatpush3.bf16.msra.mxu0 %v2375_v35 }
  0x6e   :  { %2185 = vmatprep.subr.bf16.mxu0 %v2239_v3 }
  0x71   :  { %2187 = vmatpush3.bf16.msra.mxu0 %v2388_v40 }
  0x72   :  { %2188 = vmatprep.subr.bf16.mxu0 %v2239_v3 }
  0x75   :  { %2190 = vmatpush3.bf16.msra.mxu0 %v2516_v33 }
  0x76   :  { %2191 = vmatprep.subr.bf16.mxu0 %v2239_v3 }
  0x79   :  { %2193 = vmatpush3.bf16.msra.mxu0 %v2528_v37 }
  0x7a   :  { %2194 = vmatprep.subr.bf16.mxu0 %v2239_v3 }
  0x7d   :  { %2196 = vmatpush3.bf16.msra.mxu0 %v2540_v41 }
  0x7e   :  { %2197 = vmatprep.subr.bf16.mxu0 %v2239_v3 }
  0x81   :  { %2199 = vmatpush3.bf16.msra.mxu0 %v2552_v45 }
  0x82   :  { %2200 = vmatprep.subr.bf16.mxu0 %v2239_v3 }
 0x137   :  { %v2566_v47 = vpop.f32.mrb[0].mxu0 }
 0x138   :  { %v323_v48 = vmul.f32 %v2566_v47, %v2566_v47  ;;  %v2570_v49 = vpop.f32.mrb[1].mxu0 }
 0x139   :  { %v315_v50 = vadd.f32 %v2566_v47, %v2570_v49  ;;  %v322_v51 = vmul.f32 %v2570_v49, %v2570_v49 }
 0x13b   :  { %v316_v52 = vrot.slane %v315_v50, 4  ;;  %v324_v53 = vadd.f32 %v323_v48, %v322_v51  ;;  %v1358_v48 = vld [vmem:[%s2825_s4 + $0xe0] sm:$0xff] }
 0x13d   :  { %v317_v54 = vadd.f32 %v316_v52, %v315_v50  ;;  %v325_v59 = vrot.slane %v324_v53, 4  ;;  %v1359_v50 = vld [vmem:[%s2825_s4 + $0xe8] sm:$0xff]  ;;  %v1360_v52 = vld [vmem:[%s2825_s4 + $0xf0] sm:$0xff] }
 0x13e   :  { %v2104_v51 = vpack.c.bf16 %v1359_v50, %v1358_v48  ;;  %v1366_v50 = vld [vmem:[%s2825_s4 + $0x120] sm:$0xff] }
 0x13f   :  { %v318_v55 = vrot.slane %v317_v54, 2  ;;  %v326_v60 = vadd.f32 %v325_v59, %v324_v53  ;;  %v1361_v53 = vld [vmem:[%s2825_s4 + $0xf8] sm:$0xff] }
 0x141   :  { %v319_v56 = vadd.f32 %v318_v55, %v317_v54  ;;  %v327_v61 = vrot.slane %v326_v60, 2  ;;  %v2108_v54 = vpack.c.bf16 %v1361_v53, %v1360_v52  ;;  %v672_v55 = vld [vmem:[%s2825_s4] sm:$0xff] }
 0x143   :  { %v320_v57 = vrot.slane %v319_v56, 1  ;;  %v328_v62 = vadd.f32 %v327_v61, %v326_v60 }
 0x145   :  { %v321_v58 = vadd.f32 %v320_v57, %v319_v56  ;;  %v329_v63 = vrot.slane %v328_v62, 1  ;;  %v673_v56 = vld [vmem:[%s2825_s4 + $0x8] sm:$0xff] }
 0x146   :  { %v2112_v57 = vpack.c.bf16 %v673_v56, %v672_v55  ;;  %v1369_v55 = vld [vmem:[%s2825_s4 + $0x138] sm:$0xff] }
 0x147   :  { %1704 = vmatmul.mubr.f32.vlgmr.msra.gmra.mrb[0].mxu1 %v321_v58  ;;  %v330_v0 = vadd.f32 %v329_v63, %v328_v62  ;;  %v650_v58 = vlaneseq }
 0x148   :  { %2058 = vmatpush3.bf16.msra.mxu1 %v2350_v25  ;;  %1738 = vmatprep.mubr.msk.f32.mxu1 %vm2240_vm0, %v2241_v46 }
 0x149   :  { %2059 = vmatprep.subr.bf16.mxu1 %v2239_v3  ;;  %v651_v59 = vshrl.u32 %v650_v58, 7  ;;  %v1371_v58 = vld [vmem:[%s2825_s4 + $0x148] sm:$0xff] }
 0x14b   :  { %v2666_v60 = vsub.s32 0, %v651_v59 }
 0x14c   :  { %2061 = vmatpush3.bf16.msra.mxu1 %v2359_v29 }
 0x14d   :  { %2062 = vmatprep.subr.bf16.mxu1 %v2239_v3 }
 0x150   :  { %2064 = vmatpush3.bf16.msra.mxu1 %v2375_v35 }
 0x151   :  { %2065 = vmatprep.subr.bf16.mxu1 %v2239_v3 }
 0x154   :  { %2067 = vmatpush3.bf16.msra.mxu1 %v2388_v40 }
 0x155   :  { %2068 = vmatprep.subr.bf16.mxu1 %v2239_v3 }
 0x158   :  { %2070 = vmatpush3.bf16.msra.mxu1 %v2516_v33 }
 0x159   :  { %2071 = vmatprep.subr.bf16.mxu1 %v2239_v3 }
 0x15c   :  { %2073 = vmatpush3.bf16.msra.mxu1 %v2528_v37 }
 0x15d   :  { %2074 = vmatprep.subr.bf16.mxu1 %v2239_v3 }
 0x160   :  { %2076 = vmatpush3.bf16.msra.mxu1 %v2540_v41 }
 0x161   :  { %2077 = vmatprep.subr.bf16.mxu1 %v2239_v3 }
 0x164   :  { %2079 = vmatpush3.bf16.msra.mxu1 %v2552_v45 }
 0x165   :  { %1741 = vmatprep.subr.mxu1 %v2241_v46 }
 0x167   :  { %1739 = vmatmul.mubr.f32.vlgmr.msra.gmra.mrb[2].mxu1 %v330_v0 }
 0x168   :  { %1743 = vmatprep.mubr.msk.f32.mxu1 %vm2240_vm0, %v2241_v46  ;;  %1742 = vmatpush3.msk.msra.mxu1 %vm503_vm1, %v498_v1 }
 0x169   :  { %1746 = vmatprep.subr.mxu1 %v2241_v46 }
 0x21a   :  { %v413_v2 = vpop.f32.mrb[0].mxu1 }
 0x21b   :  { %v1705_v4 = vpop.f32.mrb[1].mxu1  ;;  %v487_v5 = vmul.f32 0.001953125, %v413_v2 }
 0x21d   :  { %v489_v7 = vmul.f32 %v487_v5, %v487_v5 }
 0x23a   :  { %v483_v6 = vpop.f32.mrb[2].mxu1 }
 0x23b   :  { %v488_v8 = vmul.f32 0.001953125, %v483_v6  ;;  %v1740_v9 = vpop.f32.mrb[3].mxu1 }
 0x23c   :  { %v675_v9 = vld [vmem:[%s2825_s4 + $0x18] sm:$0xff] }
 0x23d   :  { %v490_v11 = vsub.f32 %v488_v8, %v489_v7  ;;  %v674_v8 = vld [vmem:[%s2825_s4 + $0x10] sm:$0xff] }
 0x23f   :  { %v492_v12 = vadd.f32 1e-05, %v490_v11 }
 0x241   :  { %2235 = vrsqrt.f32 %v492_v12 }
 0x24b   :  { %v2236_v16 = vpop.eup %2235 }
 0x24c   :  { %v494_v17 = vmul.f32 %v2236_v16, %v491_v13  ;;  %v2116_v13 = vpack.c.bf16 %v675_v9, %v674_v8  ;;  %v679_v16 = vld [vmem:[%s2825_s4 + $0x38] sm:$0xff] }
 0x24e   :  { %1744 = vmatmul.mubr.msk.f32.vlgmr.msra.gmra.mrb[4].mxu1 %vm499_vm2, %v494_v17  ;;  %v496_v22 = vmul.f32 %v494_v17, %v487_v5 }
 0x24f   :  { %1747 = vmatpush3.msk.msra.mxu1 %vm503_vm1, %v498_v1  ;;  %1748 = vmatprep.mubr.msk.f32.mxu1 %vm2240_vm0, %v2241_v46 }
 0x250   :  { %v497_v23 = vsub.f32 %v495_v19, %v496_v22  ;;  %2081 = vmatprep.subr.bf16.mxu1 %v2080_v18  ;;  %v680_v19 = vld [vmem:[%s2825_s4 + $0x40] sm:$0xff]  ;;  %v682_v22 = vld [vmem:[%s2825_s4 + $0x50] sm:$0xff] }
 0x251   :  { %v2128_v21 = vpack.c.bf16 %v681_v20, %v680_v19 }
 0x252   :  { %1749 = vmatmul.mubr.msk.f32.vlgmr.msra.gmra.mrb[6].mxu1 %vm499_vm2, %v497_v23  ;;  %v683_v23 = vld [vmem:[%s2825_s4 + $0x58] sm:$0xff] }
 0x253   :  { %2083 = vmatpush3.bf16.msra.mxu1 %v2080_v18  ;;  %v2124_v18 = vpack.c.bf16 %v679_v16, %v678_v15 }
 0x254   :  { %2085 = vmatprep.subr.bf16.mxu1 %v2084_v24 }
 0x257   :  { %2087 = vmatpush3.bf16.msra.mxu1 %v2084_v24  ;;  %v2132_v24 = vpack.c.bf16 %v683_v23, %v682_v22 }
 0x258   :  { %2089 = vmatprep.subr.bf16.mxu1 %v2088_v28 }
 0x25b   :  { %2091 = vmatpush3.bf16.msra.mxu1 %v2088_v28  ;;  %v2136_v28 = vpack.c.bf16 %v685_v27, %v684_v26  ;;  %v1129_v27 = vld [vmem:[%s2827_s5] sm:$0x1] }
 0x25c   :  { %2093 = vmatprep.subr.bf16.mxu1 %v2092_v32 }
 0x25f   :  { %2095 = vmatpush3.bf16.msra.mxu1 %v2092_v32  ;;  %v2140_v32 = vpack.c.bf16 %v687_v31, %v686_v30  ;;  %v1133_v31 = vld [vmem:[%s2828_s6] sm:$0x1] }
 0x260   :  { %2097 = vmatprep.subr.bf16.mxu1 %v2096_v38 }
 0x263   :  { %2099 = vmatpush3.bf16.msra.mxu1 %v2096_v38  ;;  %v2144_v38 = vpack.c.bf16 %v1363_v36, %v1362_v34 }
 0x264   :  { %2101 = vmatprep.subr.bf16.mxu1 %v2100_v44 }
 0x267   :  { %2103 = vmatpush3.bf16.msra.mxu1 %v2100_v44  ;;  %v2148_v44 = vpack.c.bf16 %v1365_v42, %v1364_v39 }
 0x268   :  { %2105 = vmatprep.subr.bf16.mxu1 %v2104_v51 }
 0x26b   :  { %2107 = vmatpush3.bf16.msra.mxu1 %v2104_v51  ;;  %v1367_v51 = vld [vmem:[%s2825_s4 + $0x128] sm:$0xff] }
 0x26c   :  { %2109 = vmatprep.subr.bf16.mxu1 %v2108_v54  ;;  %v2152_v53 = vpack.c.bf16 %v1367_v51, %v1366_v50 }
 0x26f   :  { %2111 = vmatpush3.bf16.msra.mxu1 %v2108_v54  ;;  %v1368_v54 = vld [vmem:[%s2825_s4 + $0x130] sm:$0xff] }
 0x270   :  { %2113 = vmatprep.subr.bf16.mxu1 %v2112_v57  ;;  %v2156_v56 = vpack.c.bf16 %v1369_v55, %v1368_v54 }
 0x321   :  { %v573_v61 = vpop.f32.mrb[4].mxu1 }
 0x322   :  { %v653_v62 = vrot.slane %v573_v61, %v2666_v60  ;;  %v1745_v63 = vpop.f32.mrb[5].mxu1  ;;  %v1372_v61 = vld [vmem:[%s2825_s4 + $0x150] sm:$0xff] }
 0x324   :  { %v654_v0 = vmul.f32 %v653_v62, %v2570_v49  ;;  %v655_v1 = vmul.f32 %v2566_v47, %v653_v62  ;;  %v676_v47 = vld [vmem:[%s2825_s4 + $0x20] sm:$0xff]  ;;  %v677_v49 = vld [vmem:[%s2825_s4 + $0x28] sm:$0xff]  ;;  %v1373_v62 = vld [vmem:[%s2825_s4 + $0x158] sm:$0xff] }
 0x325   :  { %v646_v2 = vpop.f32.mrb[6].mxu1  ;;  %v2120_v14 = vpack.c.bf16 %v677_v49, %v676_v47  ;;  %v2164_v63 = vpack.c.bf16 %v1373_v62, %v1372_v61 }
 0x326   :  { %v659_v4 = vrot.slane %v646_v2, %v2666_v60  ;;  %v1750_v5 = vpop.f32.mrb[7].mxu1 }
 0x327   :  { %v1377_v5 = vld [vmem:[%s2825_s4 + $0x178] sm:$0xff] }
 0x328   :  { %v660_v6 = vadd.f32 %v659_v4, %v654_v0  ;;  %v661_v7 = vadd.f32 %v659_v4, %v655_v1  ;;  %v1374_v0 = vld [vmem:[%s2825_s4 + $0x160] sm:$0xff]  ;;  %v1375_v1 = vld [vmem:[%s2825_s4 + $0x168] sm:$0xff]  ;;  %v1376_v4 = vld [vmem:[%s2825_s4 + $0x170] sm:$0xff] }
 0x329   :  { %v2168_v2 = vpack.c.bf16 %v1375_v1, %v1374_v0 }
 0x32a   :  { %v662_v11 = vmax.f32 %v660_v6, 0.0  ;;  %v663_v12 = vmax.f32 %v661_v7, 0.0  ;;  %v2172_v6 = vpack.c.bf16 %v1377_v5, %v1376_v4 }
 0x32c   :  { %668 = vst [vmem:[#allocation2 + $0x1] sm:$0xff] %v662_v11  ;;  %669 = vst [vmem:[#allocation2 + $0x11] sm:$0xff] %v663_v12  ;;  %1783 = vmatprep.mubr.f32.mxu1 %v662_v11 }
 0x32d   :  { %1784 = vmatmul.mubr.f32.vlgmr.msra.gmra.mrb[8].mxu1 %v663_v12 }
 0x32e   :  { %2115 = vmatpush3.bf16.msra.mxu1 %v2112_v57  ;;  %v1370_v57 = vld [vmem:[%s2825_s4 + $0x140] sm:$0xff] }
 0x32f   :  { %2117 = vmatprep.subr.bf16.mxu1 %v2116_v13  ;;  %v2160_v59 = vpack.c.bf16 %v1371_v58, %v1370_v57 }
 0x332   :  { %2119 = vmatpush3.bf16.msra.mxu1 %v2116_v13 }
 0x333   :  { %v670_v17 = vld [vmem:[#allocation2] sm:$0xff]  ;;  %2121 = vmatprep.subr.bf16.mxu1 %v2120_v14  ;;  %v671_v48 = vld [vmem:[#allocation2 + $0x10] sm:$0xff] }
 0x334   :  { %1818 = vmatprep.mubr.f32.mxu1 %v670_v17  ;;  %v857_v52 = vld [vmem:[#allocation2 + $0x2] sm:$0xff]  ;;  %v858_v7 = vld [vmem:[#allocation2 + $0x12] sm:$0xff] }
 0x336   :  { %2123 = vmatpush3.bf16.msra.mxu1 %v2120_v14 }
 0x337   :  { %2125 = vmatprep.subr.bf16.mxu1 %v2124_v18 }
 0x33a   :  { %2127 = vmatpush3.bf16.msra.mxu1 %v2124_v18 }
 0x33b   :  { %2129 = vmatprep.subr.bf16.mxu1 %v2128_v21 }
 0x33e   :  { %2131 = vmatpush3.bf16.msra.mxu1 %v2128_v21 }
 0x33f   :  { %2133 = vmatprep.subr.bf16.mxu1 %v2132_v24 }
 0x342   :  { %2135 = vmatpush3.bf16.msra.mxu1 %v2132_v24 }
 0x343   :  { %2137 = vmatprep.subr.bf16.mxu1 %v2136_v28 }
 0x346   :  { %2139 = vmatpush3.bf16.msra.mxu1 %v2136_v28 }
 0x347   :  { %2141 = vmatprep.subr.bf16.mxu1 %v2140_v32 }
 0x34a   :  { %2143 = vmatpush3.bf16.msra.mxu1 %v2140_v32 }
 0x34b   :  { %2145 = vmatprep.subr.bf16.mxu1 %v2144_v38 }
 0x34d   :  { %1819 = vmatmul.mubr.f32.vlgmr.msra.gmra.mrb[8].mxu1 %v671_v48 }
 0x34e   :  { %2147 = vmatpush3.bf16.msra.mxu1 %v2144_v38  ;;  %1853 = vmatprep.mubr.f32.mxu1 %v857_v52 }
 0x34f   :  { %2149 = vmatprep.subr.bf16.mxu1 %v2148_v44 }
 0x352   :  { %2151 = vmatpush3.bf16.msra.mxu1 %v2148_v44 }
 0x353   :  { %2153 = vmatprep.subr.bf16.mxu1 %v2152_v53 }
 0x356   :  { %2155 = vmatpush3.bf16.msra.mxu1 %v2152_v53 }
 0x357   :  { %2157 = vmatprep.subr.bf16.mxu1 %v2156_v56 }
 0x35a   :  { %2159 = vmatpush3.bf16.msra.mxu1 %v2156_v56 }
 0x35b   :  { %2161 = vmatprep.subr.bf16.mxu1 %v2160_v59 }
 0x35e   :  { %2163 = vmatpush3.bf16.msra.mxu1 %v2160_v59 }
 0x35f   :  { %2165 = vmatprep.subr.bf16.mxu1 %v2164_v63 }
 0x362   :  { %2167 = vmatpush3.bf16.msra.mxu1 %v2164_v63 }
 0x363   :  { %2169 = vmatprep.subr.bf16.mxu1 %v2168_v2 }
 0x366   :  { %2171 = vmatpush3.bf16.msra.mxu1 %v2168_v2 }
 0x367   :  { %2173 = vmatprep.subr.bf16.mxu1 %v2172_v6 }
 0x36a   :  { %2175 = vmatpush3.bf16.msra.mxu1 %v2172_v6 }
 0x36d   :  { %1854 = vmatmul.mubr.f32.vlgmr.msra.gmra.mrb[8].mxu1 %v858_v7 }
 0x440   :  { %v2762_v8 = vpop.f32.mrb[8].mxu1 }
 0x441   :  { %v961_v9 = vmul.f32 %v2762_v8, %v2762_v8  ;;  %v2766_v11 = vpop.f32.mrb[9].mxu1 }
 0x442   :  { %v953_v12 = vadd.f32 %v2762_v8, %v2766_v11  ;;  %v960_v13 = vmul.f32 %v2766_v11, %v2766_v11 }
 0x444   :  { %v954_v47 = vrot.slane %v953_v12, 4  ;;  %v962_v49 = vadd.f32 %v961_v9, %v960_v13 }
 0x446   :  { %v955_v14 = vadd.f32 %v954_v47, %v953_v12  ;;  %v963_v19 = vrot.slane %v962_v49, 4 }
 0x448   :  { %v956_v15 = vrot.slane %v955_v14, 2  ;;  %v964_v20 = vadd.f32 %v963_v19, %v962_v49 }
 0x44a   :  { %v957_v16 = vadd.f32 %v956_v15, %v955_v14 }
 0x44c   :  { %v958_v17 = vrot.slane %v957_v16, 1 }
 0x44e   :  { %v959_v18 = vadd.f32 %v958_v17, %v957_v16 }
 0x450   :  { %1889 = vmatmul.mubr.f32.vlgmr.msra.gmra.mrb[2].mxu0 %v959_v18 }
 0x451   :  { %2202 = vmatpush3.bf16.msra.mxu0 %v2350_v25  ;;  %1923 = vmatprep.mubr.msk.f32.mxu0 %vm2240_vm0, %v2241_v46  ;;  %v965_v25 = vrot.slane %v964_v20, 2 }
 0x452   :  { %2203 = vmatprep.subr.bf16.mxu0 %v2239_v3 }
 0x455   :  { %2205 = vmatpush3.bf16.msra.mxu0 %v2359_v29  ;;  %v966_v29 = vadd.f32 %v965_v25, %v964_v20 }
 0x456   :  { %2206 = vmatprep.subr.bf16.mxu0 %v2239_v3 }
 0x459   :  { %2208 = vmatpush3.bf16.msra.mxu0 %v2375_v35  ;;  %v967_v35 = vrot.slane %v966_v29, 1 }
 0x45a   :  { %2209 = vmatprep.subr.bf16.mxu0 %v2239_v3 }
 0x45d   :  { %2211 = vmatpush3.bf16.msra.mxu0 %v2388_v40  ;;  %v968_v40 = vadd.f32 %v967_v35, %v966_v29 }
 0x45e   :  { %2212 = vmatprep.subr.bf16.mxu0 %v2239_v3 }
 0x461   :  { %2214 = vmatpush3.bf16.msra.mxu0 %v2516_v33  ;;  %v1136_v33 = vld [vmem:[%s2823_s8] sm:$0xf] }
 0x462   :  { %2215 = vmatprep.subr.bf16.mxu0 %v2239_v3 }
 0x465   :  { %2217 = vmatpush3.bf16.msra.mxu0 %v2528_v37 }
 0x466   :  { %2218 = vmatprep.subr.bf16.mxu0 %v2239_v3 }
 0x469   :  { %2220 = vmatpush3.bf16.msra.mxu0 %v2540_v41 }
 0x46a   :  { %2221 = vmatprep.subr.bf16.mxu0 %v2239_v3 }
 0x46d   :  { %2223 = vmatpush3.bf16.msra.mxu0 %v2552_v45 }
 0x46e   :  { %1926 = vmatprep.subr.mxu0 %v2241_v46 }
 0x470   :  { %1924 = vmatmul.mubr.f32.vlgmr.msra.gmra.mrb[4].mxu0 %v968_v40 }
 0x471   :  { %1928 = vmatprep.mubr.msk.f32.mxu0 %vm2240_vm0, %v2241_v46  ;;  %1927 = vmatpush3.msk.msra.mxu0 %vm503_vm1, %v1136_v33 }
 0x472   :  { %1931 = vmatprep.subr.mxu0 %v2241_v46 }
 0x523   :  { %v1051_v37 = vpop.f32.mrb[2].mxu0 }
 0x524   :  { %v1890_v3 = vpop.f32.mrb[3].mxu0  ;;  %v1125_v41 = vmul.f32 0.001953125, %v1051_v37 }
 0x526   :  { %v1127_v45 = vmul.f32 %v1125_v41, %v1125_v41 }
 0x543   :  { %v1121_v21 = vpop.f32.mrb[4].mxu0 }
 0x544   :  { %v1126_v22 = vmul.f32 0.001953125, %v1121_v21  ;;  %v1925_v23 = vpop.f32.mrb[5].mxu0 }
 0x546   :  { %v1128_v24 = vsub.f32 %v1126_v22, %v1127_v45 }
 0x548   :  { %v1130_v26 = vadd.f32 1e-05, %v1128_v24 }
 0x54a   :  { %2237 = vrsqrt.f32 %v1130_v26 }
 0x554   :  { %v2238_v28 = vpop.eup %2237 }
 0x555   :  { %v1132_v30 = vmul.f32 %v2238_v28, %v1129_v27 }
 0x557   :  { %1929 = vmatmul.mubr.msk.f32.vlgmr.msra.gmra.mrb[6].mxu0 %vm499_vm2, %v1132_v30  ;;  %v1134_v32 = vmul.f32 %v1132_v30, %v1125_v41 }
 0x558   :  { %1932 = vmatpush3.msk.msra.mxu0 %vm503_vm1, %v1136_v33  ;;  %1933 = vmatprep.mubr.msk.f32.mxu0 %vm2240_vm0, %v2241_v46 }
 0x559   :  { %v1135_v34 = vsub.f32 %v1133_v31, %v1134_v32 }
 0x55b   :  { %1934 = vmatmul.mubr.msk.f32.vlgmr.msra.gmra.mrb[8].mxu0 %vm499_vm2, %v1135_v34 }
 0x62a   :  { %v1209_v36 = vpop.f32.mrb[6].mxu0 }
 0x62b   :  { %v1289_v38 = vrot.slane %v1209_v36, %v2666_v60  ;;  %v1930_v39 = vpop.f32.mrb[7].mxu0 }
 0x62d   :  { %v1290_v42 = vmul.f32 %v1289_v38, %v2766_v11  ;;  %v1291_v44 = vmul.f32 %v2762_v8, %v1289_v38 }
 0x62e   :  { %v1282_v48 = vpop.f32.mrb[8].mxu0 }
 0x62f   :  { %v1295_v50 = vrot.slane %v1282_v48, %v2666_v60  ;;  %v1935_v51 = vpop.f32.mrb[9].mxu0 }
 0x631   :  { %v1296_v52 = vadd.f32 %v1295_v50, %v1290_v42  ;;  %v1297_v53 = vadd.f32 %v1295_v50, %v1291_v44 }
 0x633   :  { %v1300_v54 = vadd.f32 %v1296_v52, %v2314_v10  ;;  %v1301_v46 = vadd.f32 %v1297_v53, %v2400_v43 }
 0x635   :  { %v1302_v55 = vmax.f32 %v1300_v54, 0.0  ;;  %v1303_v56 = vmax.f32 %v1301_v46, 0.0 }
 0x637   :  { %1304 = vst [vmem:[%s2829_s9] sm:$0xff] %v1302_v55  ;;  %1305 = vst [vmem:[%s2829_s9 + $0x8] sm:$0xff] %v1303_v56 }

</bundles_post_ra>
